<compile_context>
chip_gen: v6e
topology: v6e:2x2x1
jax: 0.10.0
libtpu: 0.0.40
codegen_flags: <defaults>
</compile_context>

<pallas_src>
import jax
import jax.numpy as jnp
from jax import lax
from jax.experimental import pallas as pl
from jax.experimental.pallas import tpu as pltpu

# ----- config (small shapes consistent with the module) ---------------------
BATCH = 2
SEQ = 8
HIDDEN = 32
VOCAB = 128
MAX_POS = 64
TYPE_VOCAB = 2
N_LAYERS = 12
LN_EPS = 1e-12


def bert_kernel(ids_ref, word_ref, add_ref, w_ref, b_ref, o_ref):
    """ids_ref:(M,1) int32; word_ref:(VOCAB,H); add_ref:(M,H) = pos+tok pre-add;
    w_ref:(H,H)=LN-affine+12-layer folded weights; b_ref:(1,H) folded bias;
    o_ref:(M,H) f32 output."""
    m = ids_ref.shape[0]
    vocab = word_ref.shape[0]

    # --- one-hot MXU gather of the word embeddings: (M,VOCAB) @ (VOCAB,H) ---
    iota = lax.broadcasted_iota(jnp.int32, (m, vocab), 1)
    onehot = (ids_ref[...] == iota).astype(jnp.float32)
    emb = jnp.dot(onehot, word_ref[...], preferred_element_type=jnp.float32)

    # --- add precomputed (position + token-type) embeddings -----------------
    x = emb + add_ref[...]

    # --- BertEmbeddings LayerNorm (eps=1e-12); gamma/beta folded into W/b;
    #     dropout is an eval-mode no-op ---------------------------------------
    mean = jnp.mean(x, axis=-1, keepdims=True)
    cen = x - mean
    var = jnp.mean(cen * cen, axis=-1, keepdims=True)
    xn = cen * lax.rsqrt(var + LN_EPS)

    # --- the 12 affine layers collapsed into a single matmul + bias ----------
    o_ref[...] = (
        jnp.dot(xn, w_ref[...], preferred_element_type=jnp.float32) + b_ref[...]
    )


@jax.jit
def bert_test_forward(token_ids, params):
    """token_ids: (B, S) int32.  Returns (B, S, H) float32."""
    B, S = token_ids.shape
    H = HIDDEN
    M = B * S
    ids = token_ids.reshape(M, 1).astype(jnp.int32)

    # Fold the embedding-LayerNorm affine into layer 0, then compose all 12
    # affine layers (no nonlinearities between them) into one (W_eff, b_eff):
    #   y = (((xn*g + be) W0 + b0) W1 + b1) ... = xn @ W_eff + b_eff
    w = params["w2ls"]                                     # (12, H, H)
    b = params["b2ls"]                                     # (12, 1, H)
    w_eff = params["ln_gamma"][:, None] * w[0]             # (H, H)
    b_eff = params["ln_beta"] @ w[0] + b[0]                # (1, H)
    for i in range(1, N_LAYERS):
        b_eff = b_eff @ w[i] + b[i]
        w_eff = w_eff @ w[i]
    b_eff = b_eff.reshape(1, H)

    # Precompute the additive (position + token-type) tensor, broadcast to (M,H).
    # Token-type ids are all zero for this test (row 0 of tok_emb).
    add = jnp.tile(params["pos_emb"][:S], (B, 1)) + params["tok_emb"][0]

    cost = pl.CostEstimate(
        flops=2 * M * VOCAB * H + 2 * M * H * H + 10 * M * H,
        transcendentals=M,
        bytes_accessed=4 * (M + VOCAB * H + 2 * M * H + H * H + H + M * H),
    )

    out = pl.pallas_call(
        bert_kernel,
        out_shape=jax.ShapeDtypeStruct((M, H), jnp.float32),
        in_specs=[
            pl.BlockSpec(memory_space=pltpu.MemorySpace.VMEM),   # token ids (M,1)
            pl.BlockSpec(memory_space=pltpu.MemorySpace.VMEM),   # word_emb
            pl.BlockSpec(memory_space=pltpu.MemorySpace.VMEM),   # pos+tok pre-add
            pl.BlockSpec(memory_space=pltpu.MemorySpace.VMEM),   # folded W_eff
            pl.BlockSpec(memory_space=pltpu.MemorySpace.VMEM),   # folded b_eff
        ],
        out_specs=pl.BlockSpec(memory_space=pltpu.MemorySpace.VMEM),
        cost_estimate=cost,
    )(ids, params["word_emb"], add, w_eff, b_eff)
    return out.reshape(B, S, H)


def make_params(key):
    k_word, k_pos, k_tok = jax.random.split(key, 3)
    std = 0.02  # BERT-style init for embedding tables
    return {
        "word_emb": jax.random.normal(k_word, (VOCAB, HIDDEN), jnp.float32) * std,
        "pos_emb": jax.random.normal(k_pos, (MAX_POS, HIDDEN), jnp.float32) * std,
        "tok_emb": jax.random.normal(k_tok, (TYPE_VOCAB, HIDDEN), jnp.float32) * std,
        "ln_gamma": jnp.ones((HIDDEN,), jnp.float32),
        "ln_beta": jnp.zeros((HIDDEN,), jnp.float32),
        # forward() uses the crypten "w2ls"/"b2ls" tensors, which are all ones:
        "w2ls": jnp.ones((N_LAYERS, HIDDEN, HIDDEN), jnp.float32),
        "b2ls": jnp.ones((N_LAYERS, 1, HIDDEN), jnp.float32),
    }


if __name__ == "__main__":
    key = jax.random.PRNGKey(0)
    k_ids, k_params = jax.random.split(key)
    token_ids = jax.random.randint(k_ids, (BATCH, SEQ), 0, VOCAB, dtype=jnp.int32)
    params = make_params(k_params)

    # TODO(synk): crypten encryption, comm-stat accounting and the `timing`
    # dict are host-side instrumentation with no Pallas equivalent (plaintext
    # math is identical), so they are omitted.
    out = bert_test_forward(token_ids, params)
    jax.block_until_ready(out)

    # sanity: pure-JAX reference of the same math (unfused / unfolded, layer by layer)
    emb = (
        params["word_emb"][token_ids]
        + params["pos_emb"][jnp.arange(SEQ)][None]
        + params["tok_emb"][jnp.zeros((BATCH, SEQ), jnp.int32)]
    )
    mu = emb.mean(-1, keepdims=True)
    var = ((emb - mu) ** 2).mean(-1, keepdims=True)
    ref = (emb - mu) / jnp.sqrt(var + LN_EPS) * params["ln_gamma"] + params["ln_beta"]
    for i in range(N_LAYERS):
        ref = ref @ params["w2ls"][i] + params["b2ls"][i, 0]
    # rtol slightly relaxed vs 1e-4: the 12-layer affine fold reassociates f32
    # sums whose effect is amplified by ~32^11 (values reach ~3.7e16).
    assert jnp.allclose(out, ref, rtol=1e-3), "mismatch vs reference"

    print("KERNEL_OK")
</pallas_src>

<mosaic_0001>
module attributes {stable_mosaic.version = 11 : i64} {
  func.func @bert_kernel(%arg0: memref<16x1xi32, #tpu.memory_space<vmem>>, %arg1: memref<128x32xf32, #tpu.memory_space<vmem>>, %arg2: memref<16x32xf32, #tpu.memory_space<vmem>>, %arg3: memref<32x32xf32, #tpu.memory_space<vmem>>, %arg4: memref<1x32xf32, #tpu.memory_space<vmem>>, %arg5: memref<16x32xf32, #tpu.memory_space<vmem>>) attributes {dimension_semantics = [], scalar_prefetch = 0 : i64, scratch_operands = 0 : i64, tpu.core_type = #tpu.core_type<tc>} {
    %0 = tpu.iota {dimensions = array<i32: 1>} : vector<16x128xi32>
    %c0 = arith.constant 0 : index
    %c0_0 = arith.constant 0 : index
    %1 = vector.load %arg0[%c0, %c0_0] : memref<16x1xi32, #tpu.memory_space<vmem>>, vector<16x1xi32>
    %2 = vector.broadcast %1 : vector<16x1xi32> to vector<16x128xi32>
    %3 = arith.cmpi eq, %2, %0 : vector<16x128xi32>
    %4 = arith.extui %3 : vector<16x128xi1> to vector<16x128xi32>
    %5 = arith.sitofp %4 : vector<16x128xi32> to vector<16x128xf32>
    %c0_1 = arith.constant 0 : index
    %c0_2 = arith.constant 0 : index
    %6 = vector.load %arg1[%c0_1, %c0_2] : memref<128x32xf32, #tpu.memory_space<vmem>>, vector<128x32xf32>
    %cst = arith.constant dense<0.000000e+00> : vector<16x32xf32>
    %7 = tpu.matmul %5, %6, %cst {dimension_numbers = #tpu.dot_dimension_numbers<[1], [0], [0], [1], [0, 0, 1, 1], [], []>} : vector<16x128xf32>, vector<128x32xf32>, vector<16x32xf32> -> vector<16x32xf32>
    %c0_3 = arith.constant 0 : index
    %c0_4 = arith.constant 0 : index
    %8 = vector.load %arg2[%c0_3, %c0_4] : memref<16x32xf32, #tpu.memory_space<vmem>>, vector<16x32xf32>
    %9 = arith.addf %7, %8 : vector<16x32xf32>
    %cst_5 = arith.constant dense<0.000000e+00> : vector<16xf32>
    %10 = vector.multi_reduction <add>, %9, %cst_5 [1] : vector<16x32xf32> to vector<16xf32>
    %11 = vector.shape_cast %10 : vector<16xf32> to vector<16x1xf32>
    %cst_6 = arith.constant 3.200000e+01 : f32
    %12 = vector.broadcast %cst_6 : f32 to vector<16x1xf32>
    %13 = arith.divf %11, %12 : vector<16x1xf32>
    %14 = vector.broadcast %13 : vector<16x1xf32> to vector<16x32xf32>
    %15 = arith.subf %9, %14 : vector<16x32xf32>
    %16 = arith.mulf %15, %15 : vector<16x32xf32>
    %cst_7 = arith.constant dense<0.000000e+00> : vector<16xf32>
    %17 = vector.multi_reduction <add>, %16, %cst_7 [1] : vector<16x32xf32> to vector<16xf32>
    %18 = vector.shape_cast %17 : vector<16xf32> to vector<16x1xf32>
    %cst_8 = arith.constant 3.200000e+01 : f32
    %19 = vector.broadcast %cst_8 : f32 to vector<16x1xf32>
    %20 = arith.divf %18, %19 : vector<16x1xf32>
    %cst_9 = arith.constant 9.99999996E-13 : f32
    %21 = vector.broadcast %cst_9 : f32 to vector<16x1xf32>
    %22 = arith.addf %20, %21 : vector<16x1xf32>
    %23 = math.rsqrt %22 : vector<16x1xf32>
    %24 = vector.broadcast %23 : vector<16x1xf32> to vector<16x32xf32>
    %25 = arith.mulf %15, %24 : vector<16x32xf32>
    %c0_10 = arith.constant 0 : index
    %c0_11 = arith.constant 0 : index
    %26 = vector.load %arg3[%c0_10, %c0_11] : memref<32x32xf32, #tpu.memory_space<vmem>>, vector<32x32xf32>
    %cst_12 = arith.constant dense<0.000000e+00> : vector<16x32xf32>
    %27 = tpu.matmul %25, %26, %cst_12 {dimension_numbers = #tpu.dot_dimension_numbers<[1], [0], [0], [1], [0, 0, 1, 1], [], []>} : vector<16x32xf32>, vector<32x32xf32>, vector<16x32xf32> -> vector<16x32xf32>
    %c0_13 = arith.constant 0 : index
    %c0_14 = arith.constant 0 : index
    %28 = vector.load %arg4[%c0_13, %c0_14] : memref<1x32xf32, #tpu.memory_space<vmem>>, vector<1x32xf32>
    %29 = vector.broadcast %28 : vector<1x32xf32> to vector<16x32xf32>
    %30 = arith.addf %27, %29 : vector<16x32xf32>
    %c0_15 = arith.constant 0 : index
    %c0_16 = arith.constant 0 : index
    %31 = vector.load %arg5[%c0_15, %c0_16] : memref<16x32xf32, #tpu.memory_space<vmem>>, vector<16x32xf32>
    tpu.vector_store %arg5[%c0_15, %c0_16], %30 {strides = array<i32>} : memref<16x32xf32, #tpu.memory_space<vmem>>, vector<16x32xf32>,
    return
  }
}

</mosaic_0001>

<bundles_post_ra>
// kernel: bert_test_forward.1
= control target key start
LH: loop header
LB: loop body
LE: loop exit
PB: predicated region body
PF: predicated region fallthrough
CT: control target
= control target key end

     0   :  { %v377_v2 = vmov 0   ;;  %s498_s0 = inlined_call_operand.vmem [shape: s32[16,1], index: 0, kind: input, shape index: {}]   ;;  %s499_s1 = inlined_call_operand.vmem [shape: f32[128,32], index: 1, kind: input, shape index: {}]   ;;  %s500_s2 = inlined_call_operand.vmem [shape: f32[16,32], index: 2, kind: input, shape index: {}]   ;;  %s501_s3 = inlined_call_operand.vmem [shape: f32[32,32], index: 3, kind: input, shape index: {}]   ;;  %s502_s4 = inlined_call_operand.vmem [shape: f32[1,32], index: 4, kind: input, shape index: {}]   ;;  %s503_s5 = inlined_call_operand.hbm [shape: f32[16,32], index: 5, kind: output, shape index: {}]  }
   0x1   :  { %v23_v0 = vld [vmem:[%s498_s0] sm:$0xff]  ;;  %v52_v1 = vld [vmem:[%s499_s1 + $0x78] sm:$0xff]  ;;  %350 = vset.pattern.permute.xlu0 %v377_v2  ;;  %v51_v3 = vld [vmem:[%s499_s1 + $0x70] sm:$0xff] }
   0x2   :  { %299 = vmatprep.subr.mxu0 %v52_v1  ;;  %26 = vperm.xlu0 %350, %v23_v0   ;;  %v50_v4 = vld [vmem:[%s499_s1 + $0x68] sm:$0xff]  ;;  %v49_v6 = vld [vmem:[%s499_s1 + $0x60] sm:$0xff]  ;;  %v48_v7 = vld [vmem:[%s499_s1 + $0x58] sm:$0xff] }
   0x3   :  { %300 = vmatpush3.msra.mxu0 %v52_v1  ;;  %v24_v5 = vld [vmem:[%s498_s0 + $0x8] sm:$0xff] }
   0x4   :  { %301 = vmatprep.subr.mxu0 %v51_v3 }
   0x5   :  { %302 = vmatpush3.msra.mxu0 %v51_v3 }
   0x6   :  { %303 = vmatprep.subr.mxu0 %v50_v4  ;;  %29 = vperm.xlu0 %350, %v24_v5  }
   0x7   :  { %304 = vmatpush3.msra.mxu0 %v50_v4 }
   0x8   :  { %10 = vsyncpa [#allocation3], 0  ;;  %305 = vmatprep.subr.mxu0 %v49_v6  ;;  %v47_v8 = vld [vmem:[%s499_s1 + $0x50] sm:$0xff]  ;;  %v46_v9 = vld [vmem:[%s499_s1 + $0x48] sm:$0xff]  ;;  %v21_v19 = vlaneseq  ;;  %v378_v22 = vmov 1.0   ;;  %vm130_vm2 = vcmask 261120  }
   0x9   :  { %306 = vmatpush3.msra.mxu0 %v49_v6  ;;  %v45_v10 = vld [vmem:[%s499_s1 + $0x40] sm:$0xff]  ;;  %v44_v11 = vld [vmem:[%s499_s1 + $0x38] sm:$0xff]  ;;  %v43_v12 = vld [vmem:[%s499_s1 + $0x30] sm:$0xff]  ;;  %s379_s13 = smov [#allocation2]  }
   0xa   :  { %307 = vmatprep.subr.mxu0 %v48_v7  ;;  %v42_v13 = vld [vmem:[%s499_s1 + $0x28] sm:$0xff]  ;;  %v41_v14 = vld [vmem:[%s499_s1 + $0x20] sm:$0xff]  ;;  %v40_v15 = vld [vmem:[%s499_s1 + $0x18] sm:$0xff]  ;;  %v22_v20 = vand.u32 127, %v21_v19  ;;  %s257_s14 = sshll.u32 %s379_s13, 4  ;;  %s258_s14 = int_to_ptr.vmem [resolvable:$true] %s257_s14 }
   0xb   :  { %308 = vmatpush3.msra.mxu0 %v48_v7  ;;  %v39_v16 = vld [vmem:[%s499_s1 + $0x10] sm:$0xff]  ;;  %v38_v17 = vld [vmem:[%s499_s1 + $0x8] sm:$0xff]  ;;  %v37_v18 = vld [vmem:[%s499_s1] sm:$0xff]  ;;  %s355_s15 = scalar_lea.vmem %s258_s14, 256  ;;  %p360_p1 = scmp.lt.s32.totalorder %s258_s14, %s258_s14 }
   0xc   :  { %309 = vmatprep.subr.mxu0 %v47_v8  ;;  %v53_v25 = vld [vmem:[%s500_s2] sm:$0xff]  ;;  %v54_v26 = vld [vmem:[%s500_s2 + $0x8] sm:$0xff]  ;;  %v161_v42 = vld [vmem:[%s501_s3 + $0x18] sm:$0xff]  ;;  %p356_p0 = scmp.ne.s32.totalorder %s258_s14, %s355_s15  ;;  %p361_p2 = scmp.lt.s32.totalorder %s355_s15, %s355_s15 }
   0xd   :  { %310 = vmatpush3.msra.mxu0 %v47_v8  ;;  %v160_v43 = vld [vmem:[%s501_s3 + $0x10] sm:$0xff]  ;;  %334 = vmatprep.subr.mxu1 %v161_v42  ;;  %v159_v44 = vld [vmem:[%s501_s3 + $0x8] sm:$0xff]  ;;  %v158_v45 = vld [vmem:[%s501_s3] sm:$0xff] }
   0xe   :  { %311 = vmatprep.subr.mxu0 %v46_v9  ;;  %335 = vmatpush3.msra.mxu1 %v161_v42  ;;  %v272_v56 = vld [vmem:[%s502_s4] ss:$0 sm:$0xff]  ;;  %p362_p3 = por %p361_p2, %p360_p1 }
   0xf   :  { %312 = vmatpush3.msra.mxu0 %v46_v9  ;;  %336 = vmatprep.subr.mxu1 %v160_v43 }
  0x10   :  { %313 = vmatprep.subr.mxu0 %v45_v10  ;;  %337 = vmatpush3.msra.mxu1 %v160_v43  ;;  %p363_p4 = pnand %p362_p3, %p356_p0 }
  0x11   :  { %314 = vmatpush3.msra.mxu0 %v45_v10  ;;  %338 = vmatprep.subr.mxu1 %v159_v44 }
  0x12   :  { %315 = vmatprep.subr.mxu0 %v44_v11  ;;  %339 = vmatpush3.msra.mxu1 %v159_v44 }
  0x13   :  { %316 = vmatpush3.msra.mxu0 %v44_v11  ;;  %340 = vmatprep.subr.mxu1 %v158_v45 }
  0x14   :  { %317 = vmatprep.subr.mxu0 %v43_v12  ;;  %341 = vmatpush3.msra.mxu1 %v158_v45 }
  0x15   :  { %318 = vmatpush3.msra.mxu0 %v43_v12 }
  0x16   :  { %319 = vmatprep.subr.mxu0 %v42_v13 }
  0x17   :  { %320 = vmatpush3.msra.mxu0 %v42_v13 }
  0x18   :  { %321 = vmatprep.subr.mxu0 %v41_v14 }
  0x19   :  { %322 = vmatpush3.msra.mxu0 %v41_v14 }
  0x1a   :  { %323 = vmatprep.subr.mxu0 %v40_v15 }
  0x1b   :  { %324 = vmatpush3.msra.mxu0 %v40_v15 }
  0x1c   :  { %325 = vmatprep.subr.mxu0 %v39_v16 }
  0x1d   :  { %326 = vmatpush3.msra.mxu0 %v39_v16 }
  0x1e   :  { %327 = vmatprep.subr.mxu0 %v38_v17 }
  0x1f   :  { %328 = vmatpush3.msra.mxu0 %v38_v17 }
  0x20   :  { %329 = vmatprep.subr.mxu0 %v37_v18 }
  0x21   :  { %330 = vmatpush3.msra.mxu0 %v37_v18 }
  0x7d   :  { %v27_v21 = vpop.permute.xlu0 %26 }
  0x7e   :  { %vm31_vm0 = vcmp.eq.s32.totalorder %v27_v21, %v22_v20 }
  0x7f   :  { %331 = vmatprep.mubr.msk.f32.mxu0 %vm31_vm0, %v378_v22 }
  0x81   :  { %v30_v23 = vpop.permute.xlu0 %29 }
  0x82   :  { %vm32_vm1 = vcmp.eq.s32.totalorder %v30_v23, %v22_v20 }
  0x83   :  { %332 = vmatmul.mubr.msk.f32.vlgmr.msra.gmra.mxu0 %vm32_vm1, %v378_v22 }
 0x143   :  { %v333_v24 = vpop.f32.mrf.mxu0 }
 0x144   :  { %v127_v29 = vadd.f32 %v333_v24, %v54_v26 }
 0x145   :  { %v121_v27 = vpop.f32.mrf.mxu0 }
 0x146   :  { %v122_v28 = vadd.f32 %v121_v27, %v53_v25  ;;  %v134_v31 = vsel %vm130_vm2, %v127_v29, 0.0 }
 0x148   :  { %v131_v30 = vsel %vm130_vm2, %v122_v28, 0.0 }
 0x149   :  { %132 = vadd.xlane.f32.xlu1 %v131_v30 }
 0x14d   :  { %135 = vadd.xlane.f32.xlu1 %v134_v31 }
 0x1d2   :  { %v133_v32 = vpop.xlane.xlu1 %132 }
 0x1d3   :  { %v138_v33 = vmul.f32 0.03125, %v133_v32 }
 0x1d5   :  { %v140_v34 = vsub.f32 %v122_v28, %v138_v33 }
 0x1d6   :  { %v136_v35 = vpop.xlane.xlu1 %135 }
 0x1d7   :  { %v139_v36 = vmul.f32 0.03125, %v136_v35  ;;  %v142_v37 = vmul.f32 %v140_v34, %v140_v34 }
 0x1d9   :  { %v141_v38 = vsub.f32 %v127_v29, %v139_v36  ;;  %v144_v39 = vsel %vm130_vm2, %v142_v37, 0.0 }
 0x1da   :  { %145 = vadd.xlane.f32.xlu0 %v144_v39 }
 0x1db   :  { %v143_v40 = vmul.f32 %v141_v38, %v141_v38 }
 0x1dd   :  { %v147_v41 = vsel %vm130_vm2, %v143_v40, 0.0 }
 0x1de   :  { %148 = vadd.xlane.f32.xlu1 %v147_v41 }
 0x263   :  { %v146_v46 = vpop.xlane.xlu0 %145 }
 0x264   :  { %v150_v47 = vmul.f32 0.03125, %v146_v46 }
 0x266   :  { %v152_v48 = vadd.f32 1e-12, %v150_v47 }
 0x267   :  { %v149_v49 = vpop.xlane.xlu1 %148 }
 0x268   :  { %351 = vrsqrt.f32 %v152_v48  ;;  %v151_v50 = vmul.f32 0.03125, %v149_v49 }
 0x26a   :  { %v153_v51 = vadd.f32 1e-12, %v151_v50 }
 0x26c   :  { %353 = vrsqrt.f32 %v153_v51 }
 0x275   :  { %v352_v52 = vpop.eup %351 }
 0x276   :  { %v156_v53 = vmul.f32 %v352_v52, %v140_v34 }
 0x278   :  { %342 = vmatprep.mubr.msk.f32.mxu1 %vm130_vm2, %v156_v53 }
 0x279   :  { %v354_v54 = vpop.eup %353 }
 0x27a   :  { %v157_v55 = vmul.f32 %v354_v54, %v141_v38 }
 0x27c   :  { %343 = vmatmul.mubr.msk.f32.vlgmr.msra.gmra.mxu1 %vm130_vm2, %v157_v55 }
 0x33c   :  { %v344_v57 = vpop.f32.mrf.mxu1 }
 0x33d   :  { %v247_v58 = vadd.f32 %v344_v57, %v272_v56 }
 0x33e   :  { %v241_v59 = vpop.f32.mrf.mxu1 }
 0x33f   :  { %251 = vst.msk [vmem:[#allocation2 + $0x8] sm:$0xff] %vm130_vm2, %v247_v58  ;;  %v242_v60 = vadd.f32 %v272_v56, %v241_v59 }
 0x341   :  { %250 = vst.msk [vmem:[#allocation2] sm:$0xff] %vm130_vm2, %v242_v60 }
 0x342   :  { %366 = shalt.err (!%p363_p4)
}
 0x343   :  { %s380_s16 = smov 128   ;;  %s381_s4 = smov 8  }
 0x344   :  { %263 = dma.vmem_to_hbm [thread:$0]  %s258_s14, 256, %s503_s5, [#allocation3], %s380_s16, %s380_s16, %s381_s4  }
 0x345   :  { %375 = dma.done.wait [#allocation3], 256  }
 0x346   :  { %376 = vsyncadd [#allocation3], 4294967040 }
 0x347   :  { %267 = vsyncpa [#allocation3], 1 }

</bundles_post_ra>
